<compile_context>
chip_gen: v5e
topology: v5e:2x2
jax: 0.10.0
libtpu: 0.0.40
codegen_flags: <defaults>
</compile_context>

<pallas_src>
import functools
from typing import NamedTuple

import jax
import jax.numpy as jnp
from jax.experimental import pallas as pl
from jax.experimental.pallas import tpu as pltpu


class EmbedReturn(NamedTuple):
    emb: jax.Array = None
    time_emb: jax.Array = None
    style: jax.Array = None


LANE = 128    # TPU lane width (last-dim tiling unit)
SUBLANE = 8   # TPU sublane width (second-to-last-dim tiling unit)


def _round_up(x: int, m: int) -> int:
    return (x + m - 1) // m * m


def _time_embed_kernel(t_ref, w1_ref, b1_ref, w2_ref, b2_ref, o_ref):
    """Fused Linear -> SiLU -> Linear on one (tb, Ct) activation tile.

    t_ref : (tb, Ct)          f32 activation tile (streamed over the batch grid)
    w1_ref: (Ct, Co_pad)      bf16, VMEM-resident across grid steps
    b1_ref: (1, Co_pad)       f32
    w2_ref: (Co_pad, Co)      bf16, VMEM-resident across grid steps
    b2_ref: (1, Co)           f32
    o_ref : (tb, Co)          output tile (unpadded width)
    """
    # Cast to bf16 in-kernel (VPU, free) so the MXU gets bf16 operands.
    x = t_ref[...].astype(jnp.bfloat16)
    # Linear 1: bf16 x bf16 -> f32 accumulation, bias add in f32.
    h = jnp.dot(x, w1_ref[...], preferred_element_type=jnp.float32) + b1_ref[...]
    # SiLU in f32 (sigmoid -> EUP, multiply -> VPU).  Padded hidden cols are exact 0.
    h = h * jax.nn.sigmoid(h)
    # Linear 2: back to bf16 operands, f32 accumulation, f32 bias add.
    y = jnp.dot(h.astype(jnp.bfloat16), w2_ref[...],
                preferred_element_type=jnp.float32) + b2_ref[...]
    o_ref[...] = y.astype(o_ref.dtype)


@functools.partial(jax.jit, static_argnames=("block_rows", "out_dtype"))
def time_embed_mlp(time_emb, w1, b1, w2, b2, *, block_rows=None, out_dtype=None):
    """Fused Linear -> SiLU -> Linear via Pallas.

    w1: (Ct, Co_pad) bf16, b1: (1, Co_pad) f32, w2: (Co_pad, Co) bf16, b2: (1, Co) f32.
    Returns (B, Co) in `out_dtype` (defaults to time_emb.dtype).
    """
    B, Ct = time_emb.shape
    Ct_w, Co_pad = w1.shape
    Co_pad2, Co = w2.shape
    assert Ct_w == Ct and Co_pad2 == Co_pad and b1.shape == (1, Co_pad) and b2.shape == (1, Co)
    out_dtype = time_emb.dtype if out_dtype is None else out_dtype

    # Balanced batch tiling: tiles <= ~512 rows, padding < 8 rows per tile, and
    # >= 2 grid steps whenever B allows so the "parallel" axis feeds both TCs on v7x.
    if block_rows is None:
        n_tiles = max(pl.cdiv(B, 512), 2) if B >= 2 * SUBLANE else 1
        tb = _round_up(pl.cdiv(B, n_tiles), SUBLANE)
    else:
        tb = max(SUBLANE, _round_up(block_rows, SUBLANE))
    tb = min(tb, _round_up(B, SUBLANE))
    grid = (pl.cdiv(B, tb),)

    out_bytes = jnp.dtype(out_dtype).itemsize
    cost = pl.CostEstimate(
        flops=2 * B * (Ct * Co_pad + Co_pad * Co),
        transcendentals=B * Co_pad,  # sigmoid in SiLU
        bytes_accessed=(B * Ct * time_emb.dtype.itemsize   # activations in
                        + Ct * Co_pad * 2 + Co_pad * Co * 2  # bf16 weights
                        + (Co_pad + Co) * 4                  # f32 biases
                        + B * Co * out_bytes),               # output
    )

    return pl.pallas_call(
        _time_embed_kernel,
        out_shape=jax.ShapeDtypeStruct((B, Co), out_dtype),
        grid_spec=pltpu.PrefetchScalarGridSpec(
            num_scalar_prefetch=0,
            grid=grid,
            in_specs=[
                # Activations stream over the batch grid (auto double-buffered).
                # Last block dim == full array dim (Ct), so no lane padding needed.
                pl.BlockSpec((tb, Ct), lambda i: (i, 0)),
                # Weights / biases: constant index_map -> resident in VMEM across steps.
                # (On v7x at production widths, add pipeline_mode=pl.Buffered(1) here.)
                pl.BlockSpec((Ct, Co_pad), lambda i: (0, 0)),
                pl.BlockSpec((1, Co_pad), lambda i: (0, 0)),
                pl.BlockSpec((Co_pad, Co), lambda i: (0, 0)),
                pl.BlockSpec((1, Co), lambda i: (0, 0)),
            ],
            out_specs=pl.BlockSpec((tb, Co), lambda i: (i, 0)),
        ),
        compiler_params=pltpu.CompilerParams(
            # Batch tiles are independent -> shard grid steps across TensorCores on v7x.
            dimension_semantics=("parallel",),
        ),
        cost_estimate=cost,
    )(time_emb, w1, b1, w2, b2)


def time_style_seperate_embed_forward(params, time_emb=None, cond=None):
    """Mirrors TimeStyleSeperateEmbed.forward."""
    if time_emb is None:
        t_out = None
    else:
        t_out = time_embed_mlp(time_emb, params["w1"], params["b1"],
                               params["w2"], params["b2"])
    style = cond  # nn.Identity
    return EmbedReturn(emb=style, time_emb=t_out, style=style)


def init_params(key, time_channels, time_out_channels, dtype=jnp.float32):
    """Deterministic synthetic parameters (shapes from the module's __init__)."""
    k1, k2, k3, k4 = jax.random.split(key, 4)
    scale1 = 1.0 / jnp.sqrt(time_channels)
    scale2 = 1.0 / jnp.sqrt(time_out_channels)
    return {
        "w1": (jax.random.normal(k1, (time_channels, time_out_channels)) * scale1).astype(dtype),
        "b1": (jax.random.normal(k2, (1, time_out_channels)) * 0.01).astype(dtype),
        "w2": (jax.random.normal(k3, (time_out_channels, time_out_channels)) * scale2).astype(dtype),
        "b2": (jax.random.normal(k4, (1, time_out_channels)) * 0.01).astype(dtype),
    }


def prepare_params(raw):
    """One-time prep: pad only the *hidden* dim to a multiple of 128, cast weights to bf16.

    Exact: padded hidden cols see zero W1 cols + zero bias (SiLU(0)=0) and zero W2
    rows, so they contribute nothing.  Output width stays unpadded (Co).
    """
    Ct, Co = raw["w1"].shape
    Co_pad = _round_up(Co, LANE)
    w1 = jnp.zeros((Ct, Co_pad), jnp.bfloat16).at[:, :Co].set(raw["w1"].astype(jnp.bfloat16))
    b1 = jnp.zeros((1, Co_pad), jnp.float32).at[:, :Co].set(
        raw["b1"].astype(jnp.float32).reshape(1, Co))
    w2 = jnp.zeros((Co_pad, Co), jnp.bfloat16).at[:Co, :].set(raw["w2"].astype(jnp.bfloat16))
    b2 = raw["b2"].astype(jnp.float32).reshape(1, Co)
    return {"w1": w1, "b1": b1, "w2": w2, "b2": b2}


if __name__ == "__main__":
    key = jax.random.PRNGKey(0)
    kt, kc, kp = jax.random.split(key, 3)

    B = 8
    time_channels = 32
    time_out_channels = 64
    cond_dim = 64

    time_emb = jax.random.normal(kt, (B, time_channels), dtype=jnp.float32)
    cond = jax.random.normal(kc, (B, cond_dim), dtype=jnp.float32)

    raw_params = init_params(kp, time_channels, time_out_channels)
    params = prepare_params(raw_params)

    out = time_style_seperate_embed_forward(params, time_emb=time_emb, cond=cond)
    jax.block_until_ready(out.time_emb)
    jax.block_until_ready(out.style)

    # Reference 1: same bf16-operand / f32-accumulate math in plain JAX.
    xb = time_emb.astype(jnp.bfloat16)
    h_b = jnp.dot(xb, params["w1"][:, :time_out_channels],
                  preferred_element_type=jnp.float32) + raw_params["b1"]
    h_b = h_b * jax.nn.sigmoid(h_b)
    ref_b = jnp.dot(h_b.astype(jnp.bfloat16), params["w2"][:time_out_channels, :],
                    preferred_element_type=jnp.float32) + raw_params["b2"]

    # Reference 2: full-precision f32 semantics of the PyTorch module.
    h_f = time_emb @ raw_params["w1"] + raw_params["b1"]
    h_f = h_f * jax.nn.sigmoid(h_f)
    ref_f = h_f @ raw_params["w2"] + raw_params["b2"]

    assert out.time_emb.shape == (B, time_out_channels)
    assert out.time_emb.dtype == time_emb.dtype
    assert jnp.allclose(out.time_emb, ref_b, atol=2e-3, rtol=2e-3), \
        float(jnp.max(jnp.abs(out.time_emb - ref_b)))
    assert jnp.allclose(out.time_emb, ref_f, atol=5e-2, rtol=5e-2), \
        float(jnp.max(jnp.abs(out.time_emb - ref_f)))
    assert jnp.array_equal(out.style, cond)
    assert jnp.array_equal(out.emb, cond)

    # Larger / non-divisible batch exercises the multi-step "parallel" grid and the
    # clipped partial last block (B=20 -> tb=8, grid=(3,)).
    tb_big = jax.random.normal(kt, (20, time_channels), dtype=jnp.float32)
    out_big = time_embed_mlp(tb_big, params["w1"], params["b1"], params["w2"], params["b2"])
    h_big = tb_big @ raw_params["w1"] + raw_params["b1"]
    h_big = h_big * jax.nn.sigmoid(h_big)
    ref_big = h_big @ raw_params["w2"] + raw_params["b2"]
    assert out_big.shape == (20, time_out_channels)
    assert jnp.allclose(out_big, ref_big, atol=5e-2, rtol=5e-2), \
        float(jnp.max(jnp.abs(out_big - ref_big)))

    # None passthrough branch (time_emb is None).
    out_none = time_style_seperate_embed_forward(params, time_emb=None, cond=cond)
    assert out_none.time_emb is None and jnp.array_equal(out_none.style, cond)

    print("KERNEL_OK")
</pallas_src>

<mosaic_0001>
module attributes {stable_mosaic.version = 11 : i64} {
  func.func @_time_embed_kernel(%arg0: i32, %arg1: memref<8x32xf32, #tpu.memory_space<vmem>>, %arg2: memref<32x128xbf16, #tpu.memory_space<vmem>>, %arg3: memref<1x128xf32, #tpu.memory_space<vmem>>, %arg4: memref<128x64xbf16, #tpu.memory_space<vmem>>, %arg5: memref<1x64xf32, #tpu.memory_space<vmem>>, %arg6: memref<8x64xf32, #tpu.memory_space<vmem>>) attributes {dimension_semantics = [#tpu.dimension_semantics<parallel>], iteration_bounds = array<i64: 1>, scalar_prefetch = 0 : i64, scratch_operands = 0 : i64, tpu.core_type = #tpu.core_type<tc>, window_params = [{transform_indices = @transform_0, window_bounds = array<i64: 8, 32>}, {pipeline_mode = #tpu.pipeline_mode<synchronous>, transform_indices = @transform_1, window_bounds = array<i64: 32, 128>}, {pipeline_mode = #tpu.pipeline_mode<synchronous>, transform_indices = @transform_2, window_bounds = array<i64: 1, 128>}, {pipeline_mode = #tpu.pipeline_mode<synchronous>, transform_indices = @transform_3, window_bounds = array<i64: 128, 64>}, {pipeline_mode = #tpu.pipeline_mode<synchronous>, transform_indices = @transform_4, window_bounds = array<i64: 1, 64>}, {transform_indices = @transform_5, window_bounds = array<i64: 8, 64>}]} {
    %c0 = arith.constant 0 : index
    %c0_0 = arith.constant 0 : index
    %0 = vector.load %arg1[%c0, %c0_0] : memref<8x32xf32, #tpu.memory_space<vmem>>, vector<8x32xf32>
    %1 = arith.truncf %0 : vector<8x32xf32> to vector<8x32xbf16>
    %c0_1 = arith.constant 0 : index
    %c0_2 = arith.constant 0 : index
    %2 = vector.load %arg2[%c0_1, %c0_2] : memref<32x128xbf16, #tpu.memory_space<vmem>>, vector<32x128xbf16>
    %cst = arith.constant dense<0.000000e+00> : vector<8x128xf32>
    %3 = tpu.matmul %1, %2, %cst {dimension_numbers = #tpu.dot_dimension_numbers<[1], [0], [0], [1], [0, 0, 1, 1], [], []>} : vector<8x32xbf16>, vector<32x128xbf16>, vector<8x128xf32> -> vector<8x128xf32>
    %c0_3 = arith.constant 0 : index
    %c0_4 = arith.constant 0 : index
    %4 = vector.load %arg3[%c0_3, %c0_4] : memref<1x128xf32, #tpu.memory_space<vmem>>, vector<1x128xf32>
    %5 = vector.broadcast %4 : vector<1x128xf32> to vector<8x128xf32>
    %6 = arith.addf %3, %5 : vector<8x128xf32>
    %7 = arith.negf %6 : vector<8x128xf32>
    %8 = math.exp %7 : vector<8x128xf32>
    %cst_5 = arith.constant 1.000000e+00 : f32
    %9 = vector.broadcast %cst_5 : f32 to vector<8x128xf32>
    %10 = arith.addf %9, %8 : vector<8x128xf32>
    %11 = arith.divf %9, %10 : vector<8x128xf32>
    %12 = arith.mulf %6, %11 : vector<8x128xf32>
    %13 = arith.truncf %12 : vector<8x128xf32> to vector<8x128xbf16>
    %c0_6 = arith.constant 0 : index
    %c0_7 = arith.constant 0 : index
    %14 = vector.load %arg4[%c0_6, %c0_7] : memref<128x64xbf16, #tpu.memory_space<vmem>>, vector<128x64xbf16>
    %cst_8 = arith.constant dense<0.000000e+00> : vector<8x64xf32>
    %15 = tpu.matmul %13, %14, %cst_8 {dimension_numbers = #tpu.dot_dimension_numbers<[1], [0], [0], [1], [0, 0, 1, 1], [], []>} : vector<8x128xbf16>, vector<128x64xbf16>, vector<8x64xf32> -> vector<8x64xf32>
    %c0_9 = arith.constant 0 : index
    %c0_10 = arith.constant 0 : index
    %16 = vector.load %arg5[%c0_9, %c0_10] : memref<1x64xf32, #tpu.memory_space<vmem>>, vector<1x64xf32>
    %17 = vector.broadcast %16 : vector<1x64xf32> to vector<8x64xf32>
    %18 = arith.addf %15, %17 : vector<8x64xf32>
    %c0_11 = arith.constant 0 : index
    %c0_12 = arith.constant 0 : index
    %19 = vector.load %arg6[%c0_11, %c0_12] : memref<8x64xf32, #tpu.memory_space<vmem>>, vector<8x64xf32>
    tpu.vector_store %arg6[%c0_11, %c0_12], %18 {strides = array<i32>} : memref<8x64xf32, #tpu.memory_space<vmem>>, vector<8x64xf32>,
    return
  }
  func.func @transform_0(%arg0: i32) -> (i32, i32) {
    %c0_i32 = arith.constant 0 : i32
    %c0_i32_0 = arith.constant 0 : i32
    return %arg0, %c0_i32 : i32, i32
  }
  func.func @transform_1(%arg0: i32) -> (i32, i32) {
    %c0_i32 = arith.constant 0 : i32
    %c0_i32_0 = arith.constant 0 : i32
    %c0_i32_1 = arith.constant 0 : i32
    return %c0_i32, %c0_i32_0 : i32, i32
  }
  func.func @transform_2(%arg0: i32) -> (i32, i32) {
    %c0_i32 = arith.constant 0 : i32
    %c0_i32_0 = arith.constant 0 : i32
    %c0_i32_1 = arith.constant 0 : i32
    return %c0_i32, %c0_i32_0 : i32, i32
  }
  func.func @transform_3(%arg0: i32) -> (i32, i32) {
    %c0_i32 = arith.constant 0 : i32
    %c0_i32_0 = arith.constant 0 : i32
    %c0_i32_1 = arith.constant 0 : i32
    return %c0_i32, %c0_i32_0 : i32, i32
  }
  func.func @transform_4(%arg0: i32) -> (i32, i32) {
    %c0_i32 = arith.constant 0 : i32
    %c0_i32_0 = arith.constant 0 : i32
    %c0_i32_1 = arith.constant 0 : i32
    return %c0_i32, %c0_i32_0 : i32, i32
  }
  func.func @transform_5(%arg0: i32) -> (i32, i32) {
    %c0_i32 = arith.constant 0 : i32
    %c0_i32_0 = arith.constant 0 : i32
    return %arg0, %c0_i32 : i32, i32
  }
}

</mosaic_0001>

<bundles_post_ra>
// kernel: time_embed_mlp.1
= control target key start
LH: loop header
LB: loop body
LE: loop exit
PB: predicated region body
PF: predicated region fallthrough
CT: control target
= control target key end

     0   :  { %s339_s0 = inlined_call_operand.vmem [shape: f32[8,32], index: 0, kind: input, shape index: {}]   ;;  %s340_s1 = inlined_call_operand.vmem [shape: bf16[32,128], index: 1, kind: input, shape index: {}]   ;;  %s341_s2 = inlined_call_operand.vmem [shape: f32[1,128], index: 2, kind: input, shape index: {}]   ;;  %s342_s3 = inlined_call_operand.vmem [shape: bf16[128,64], index: 3, kind: input, shape index: {}]   ;;  %s343_s4 = inlined_call_operand.vmem [shape: f32[1,64], index: 4, kind: input, shape index: {}]   ;;  %s344_s5 = inlined_call_operand.hbm [shape: f32[8,64], index: 5, kind: output, shape index: {}]  }
   0x1   :  { %v224_v0 = vld [vmem:[%s340_s1 + $0x8] sm:$0xff]  ;;  %v223_v1 = vld [vmem:[%s340_s1] sm:$0xff] }
   0x2   :  { %54 = vmatpush.bf16.msra.mxu0 %v224_v0  ;;  %v22_v2 = vld [vmem:[%s339_s0] sm:$0xff] }
   0x3   :  { %10 = vsyncpa [#allocation3], 0  ;;  %v23_v3 = vpack.c.bf16 %v22_v2, %v22_v2  ;;  %vm44_vm0 = vcmask 261120   ;;  %v232_v4 = vld [vmem:[%s342_s3 + $0x38] sm:$0xff]  ;;  %v231_v5 = vld [vmem:[%s342_s3 + $0x30] sm:$0xff]  ;;  %s266_s15 = smov [#allocation2]  }
   0x4   :  { %150 = vmatpush.bf16.msra.mxu1 %v232_v4  ;;  %v230_v6 = vld [vmem:[%s342_s3 + $0x28] sm:$0xff]  ;;  %v229_v7 = vld [vmem:[%s342_s3 + $0x20] sm:$0xff]  ;;  %v228_v8 = vld [vmem:[%s342_s3 + $0x18] sm:$0xff]  ;;  %s170_s16 = sshll.u32 %s266_s15, 4  ;;  %s172_s19 = sshll.u32 %s344_s5, 4  ;;  %vm163_vm5 = vcmask 523264   ;;  %s171_s16 = int_to_ptr.vmem [resolvable:$true] %s170_s16  ;;  %s173_s19 = int_to_ptr.hbm [resolvable:$true] %s172_s19 }
   0x5   :  { %v227_v9 = vld [vmem:[%s342_s3 + $0x10] sm:$0xff]  ;;  %v226_v10 = vld [vmem:[%s342_s3 + $0x8] sm:$0xff]  ;;  %v225_v11 = vld [vmem:[%s342_s3] sm:$0xff] }
   0x6   :  { %55 = vmatpush.bf16.msra.mxu0 %v223_v1  ;;  %v234_v12 = vld [vmem:[%s341_s2] ss:$0 sm:$0xff] }
   0x7   :  { %v235_v31 = vld [vmem:[%s343_s4] ss:$0 sm:$0xff] }
   0x8   :  { %151 = vmatpush.bf16.msra.mxu1 %v231_v5 }
   0x9   :  { %189 = vmatmul.msk.bf16.vlgmr.msra.gmra.mxu0 %vm44_vm0, %v23_v3 }
   0xc   :  { %152 = vmatpush.bf16.msra.mxu1 %v230_v6 }
  0x10   :  { %153 = vmatpush.bf16.msra.mxu1 %v229_v7 }
  0x14   :  { %154 = vmatpush.bf16.msra.mxu1 %v228_v8 }
  0x18   :  { %155 = vmatpush.bf16.msra.mxu1 %v227_v9 }
  0x1c   :  { %156 = vmatpush.bf16.msra.mxu1 %v226_v10 }
  0x20   :  { %157 = vmatpush.bf16.msra.mxu1 %v225_v11 }
  0x86   :  { %v57_v13 = vpop.f32.mrf.mxu0 }
  0x87   :  { %v58_v14 = vadd.f32 %v234_v12, %v57_v13 }
  0x89   :  { %v190_v15 = vmul.f32 -1.442695, %v58_v14 }
  0x8b   :  { %236 = vpow2.f32 %v190_v15 }
  0x8e   :  { %v59_v16 = vpop.f32.mrf.mxu0 }
  0x91   :  { %v237_v17 = vpop.eup %236 }
  0x92   :  { %v64_v18 = vadd.f32 1.0, %v237_v17 }
  0x94   :  { %238 = vrcp.f32 %v64_v18  ;;  %v76_v22 = vand.u32 2147483648, %v64_v18  ;;  %v74_v24 = vand.u32 2147483647, %v64_v18  ;;  %vm70_vm2 = vweird.f32 %v64_v18 }
  0x96   :  { %v77_v26 = vor.u32 1.1754944e-38, %v76_v22  ;;  %vm75_vm4 = vcmp.eq.f32.partialorder %v74_v24, 8.507059e+37 }
  0x9a   :  { %v239_v19 = vpop.eup %238 }
  0x9b   :  { %v66_v20 = vmul.f32 %v239_v19, %v64_v18  ;;  %vm71_vm1 = vweird.f32 %v239_v19 }
  0x9c   :  { %vm72_vm3 = vmor %vm70_vm2, %vm71_vm1 }
  0x9d   :  { %v67_v21 = vsub.f32 1.0, %v66_v20 }
  0x9f   :  { %v68_v23 = vmul.f32 %v239_v19, %v67_v21 }
  0xa1   :  { %v69_v25 = vadd.f32 %v239_v19, %v68_v23 }
  0xa3   :  { %v73_v27 = vsel %vm72_vm3, %v239_v19, %v69_v25 }
  0xa4   :  { %v78_v28 = vsel %vm75_vm4, %v77_v26, %v73_v27 }
  0xa5   :  { %v80_v29 = vmul.f32 %v78_v28, %v58_v14 }
  0xa7   :  { %v81_v30 = vpack.c.bf16 %v80_v29, %v80_v29 }
  0xa9   :  { %158 = vmatmul.bf16.vlgmr.msra.gmra.mxu1 %v81_v30 }
 0x126   :  { %v159_v32 = vpop.f32.mrf.mxu1 }
 0x127   :  { %v160_v33 = vadd.f32 %v235_v31, %v159_v32 }
 0x129   :  { %164 = vst.msk [vmem:[#allocation2] sm:$0xff] %vm163_vm5, %v160_v33 }
 0x12a   :  { %175 = dma.vmem_to_hbm [thread:$0]  %s171_s16, 128, %s173_s19, [#allocation3]  }
 0x12e   :  { %v161_v34 = vpop.f32.mrf.mxu1 }
 0x12f   :  { %264 = dma.done.wait [#allocation3], 128  }
 0x130   :  { %265 = vsyncadd [#allocation3], 4294967168 }
 0x131   :  { %180 = vsyncpa [#allocation3], 1 }

</bundles_post_ra>
